<compile_context>
chip_gen: v7x
topology: tpu7x:2x2x1
jax: 0.10.0
libtpu: 0.0.40
codegen_flags: <defaults>
</compile_context>

<pallas_src>
import jax
import jax.numpy as jnp
from jax.experimental import pallas as pl
from jax.experimental.pallas import tpu as pltpu

K = 3       # kernel_size
POOL = 2    # pool_size


def f_conv_kernel(mask_first_ref, mask_last_ref, x_ref,
                  w1_ref, b1_ref, w2_ref, b2_ref, o_ref, y2_ref):
    # mask_first_ref: (R, 1) f32 -- 0.0 at the first position of each sample, else 1.0
    # mask_last_ref : (R, 1) f32 -- 0.0 at the last  position of each sample, else 1.0
    # x_ref : (R, Cin)           -- R = b_tile * L rows, channels on lanes
    # w1_ref: (Cin,  K*Cout)     -- the K taps' weights side by side
    # b1_ref: (1, Cout) f32
    # w2_ref: (Cout, K*Cout)
    # b2_ref: (1, Cout) f32
    # o_ref : (R // POOL, Cout)
    # y2_ref: (R, Cout) f32 scratch -- conv2 output, reread with sublane stride 2
    cout = o_ref.shape[-1]
    m_first = mask_first_ref[...]
    m_last = mask_last_ref[...]

    def conv3(v, w_ref, b_ref):
        # One MXU matmul per conv, then recombine the K=3 taps:
        #   out[r] = p0[r-1] + p1[r] + p2[r+1]   (zero across sample boundaries)
        # Shifts act on the f32 products (cyclic XLU rolls + VPU masks), so no
        # padded copy of the activations and no scratch round trip is needed.
        p = jnp.dot(v, w_ref[...], preferred_element_type=jnp.float32)
        rows = p.shape[0]
        p0 = p[:, 0 * cout:1 * cout]
        p1 = p[:, 1 * cout:2 * cout]
        p2 = p[:, 2 * cout:3 * cout]
        acc = p1
        # p0[r-1]: cyclic shift down by 1; wrap-around killed by m_first.
        acc = acc + m_first * pltpu.roll(p0, shift=1, axis=0)
        # p2[r+1]: cyclic shift up by 1 == non-negative shift (rows - 1);
        # wrap-around killed by m_last.
        acc = acc + m_last * pltpu.roll(p2, shift=rows - 1, axis=0)
        return jnp.maximum(acc + b_ref[...], 0.0)

    x = x_ref[...]
    h1 = conv3(x, w1_ref, b1_ref)                             # conv1 + bias + ReLU (f32)
    y2_ref[...] = conv3(h1.astype(x.dtype), w2_ref, b2_ref)   # conv2 + bias + ReLU

    # MaxPool1d(kernel_size=2, stride=2) along the row (length) axis via
    # sublane-strided ref reads; single lane-contiguous output store.
    rh = o_ref.shape[0]
    even = y2_ref[pl.ds(0, rh, stride=POOL), :]
    odd = y2_ref[pl.ds(1, rh, stride=POOL), :]
    o_ref[...] = jnp.maximum(even, odd).astype(o_ref.dtype)


def f_conv(x, w1, b1, w2, b2, *, max_block_rows=1024, compute_dtype=jnp.float32):
    """x: (N, C_in, L); w1: (C_out, C_in, K); w2: (C_out, C_out, K) -> (N, C_out, L//2)."""
    N, Cin, L = x.shape
    Cout = w1.shape[0]
    assert w1.shape == (Cout, Cin, K) and w2.shape == (Cout, Cout, K)
    # TODO(synk): odd L (PyTorch MaxPool1d drops the trailing column); assume even L here.
    assert L % POOL == 0, "kernel fast path assumes an even sequence length"
    Lh = L // POOL

    # Batch tile: as many whole samples per grid step as fit the row budget,
    # keeping block row counts sublane-aligned when there is more than one block.
    candidates = [d for d in range(1, N + 1)
                  if N % d == 0 and (d == N or ((d * L) % 8 == 0 and (d * Lh) % 8 == 0))]
    fitting = [d for d in candidates if d * L <= max_block_rows]
    b_tile = max(fitting) if fitting else min(candidates)
    grid = (N // b_tile,)
    rows = b_tile * L
    rows_out = b_tile * Lh

    # ---- one-time layout work in XLA (no padded copy of x) ----
    # (N, Cin, L) -> (N*L, Cin): length+batch on sublanes, channels on lanes.
    x_rows = jnp.transpose(x, (0, 2, 1)).reshape(N * L, Cin).astype(compute_dtype)
    # (Cout, Cin, K) -> (Cin, K*Cout): the K taps side by side -> one matmul per conv.
    w1_f = jnp.transpose(w1, (1, 2, 0)).reshape(Cin, K * Cout).astype(compute_dtype)
    w2_f = jnp.transpose(w2, (1, 2, 0)).reshape(Cout, K * Cout).astype(compute_dtype)
    b1_2d = b1.reshape(1, Cout).astype(jnp.float32)
    b2_2d = b2.reshape(1, Cout).astype(jnp.float32)

    # Per-sample boundary masks (the conv's zero padding); identical for every
    # grid step, so they stay resident in VMEM.
    pos = jnp.arange(rows, dtype=jnp.int32) % L
    mask_first = (pos != 0).astype(jnp.float32).reshape(rows, 1)
    mask_last = (pos != L - 1).astype(jnp.float32).reshape(rows, 1)

    cost = pl.CostEstimate(
        flops=2 * N * L * K * Cout * (Cin + Cout) + 6 * N * L * Cout,
        transcendentals=0,
        bytes_accessed=(x_rows.size * x_rows.dtype.itemsize
                        + w1_f.size * w1_f.dtype.itemsize
                        + w2_f.size * w2_f.dtype.itemsize
                        + 4 * (b1_2d.size + b2_2d.size + mask_first.size + mask_last.size)
                        + N * Lh * Cout * x.dtype.itemsize),
    )

    out_rows = pl.pallas_call(
        f_conv_kernel,
        out_shape=jax.ShapeDtypeStruct((N * Lh, Cout), x.dtype),
        grid_spec=pltpu.PrefetchScalarGridSpec(
            num_scalar_prefetch=0,
            grid=grid,
            in_specs=[
                pl.BlockSpec((rows, 1), lambda n: (0, 0)),          # mask_first
                pl.BlockSpec((rows, 1), lambda n: (0, 0)),          # mask_last
                pl.BlockSpec((rows, Cin), lambda n: (n, 0)),        # activations
                pl.BlockSpec((Cin, K * Cout), lambda n: (0, 0)),    # w1 (fused taps)
                pl.BlockSpec((1, Cout), lambda n: (0, 0)),          # b1
                pl.BlockSpec((Cout, K * Cout), lambda n: (0, 0)),   # w2 (fused taps)
                pl.BlockSpec((1, Cout), lambda n: (0, 0)),          # b2
            ],
            out_specs=pl.BlockSpec((rows_out, Cout), lambda n: (n, 0)),
            scratch_shapes=[pltpu.VMEM((rows, Cout), jnp.float32)],
        ),
        compiler_params=pltpu.CompilerParams(
            dimension_semantics=("parallel",),
            vmem_limit_bytes=32 * 1024 * 1024,
        ),
        cost_estimate=cost,
    )(mask_first, mask_last, x_rows, w1_f, b1_2d, w2_f, b2_2d)

    # back to the PyTorch layout (N, C_out, L // POOL)
    return jnp.transpose(out_rows.reshape(N, Lh, Cout), (0, 2, 1))


def ref_forward(x, w1, b1, w2, b2):
    """Pure-JAX reference matching the PyTorch module (f32)."""
    dn = ("NCH", "OIH", "NCH")
    y = jax.lax.conv_general_dilated(x, w1, (1,), [(1, 1)], dimension_numbers=dn)
    y = jnp.maximum(y + b1[None, :, None], 0.0)
    y = jax.lax.conv_general_dilated(y, w2, (1,), [(1, 1)], dimension_numbers=dn)
    y = jnp.maximum(y + b2[None, :, None], 0.0)
    N, C, L = y.shape
    Lh = L // POOL
    return y[:, :, : Lh * POOL].reshape(N, C, Lh, POOL).max(-1)


if __name__ == "__main__":
    key = jax.random.PRNGKey(0)
    k1, k2, k3, k4, k5 = jax.random.split(key, 5)
    N, Cin, Cout, L = 2, 4, 8, 16

    x = jax.random.normal(k1, (N, Cin, L), jnp.float32)
    # Conv1d weight shape: (C_out, C_in, K)
    w1 = jax.random.normal(k2, (Cout, Cin, K), jnp.float32) * 0.2
    b1 = jax.random.normal(k3, (Cout,), jnp.float32) * 0.1
    w2 = jax.random.normal(k4, (Cout, Cout, K), jnp.float32) * 0.2
    b2 = jax.random.normal(k5, (Cout,), jnp.float32) * 0.1

    ref = ref_forward(x, w1, b1, w2, b2)

    # Default f32 path: must match the PyTorch-equivalent reference tightly.
    out = jax.block_until_ready(f_conv(x, w1, b1, w2, b2))
    assert out.shape == (N, Cout, L // POOL), out.shape
    assert jnp.allclose(out, ref, atol=1e-4, rtol=1e-4), float(
        jnp.max(jnp.abs(out - ref))
    )

    # bf16-fed MXU path (v6e/v7x recommendation): same semantics, bf16 input rounding.
    out_bf16 = jax.block_until_ready(
        f_conv(x, w1, b1, w2, b2, compute_dtype=jnp.bfloat16)
    )
    assert out_bf16.shape == (N, Cout, L // POOL), out_bf16.shape
    assert jnp.allclose(out_bf16, ref, atol=1e-1, rtol=5e-2), float(
        jnp.max(jnp.abs(out_bf16 - ref))
    )

    print("KERNEL_OK")
</pallas_src>

<mosaic_0001>
module attributes {stable_mosaic.version = 11 : i64} {
  func.func @f_conv_kernel(%arg0: i32, %arg1: memref<32x1xf32, #tpu.memory_space<vmem>>, %arg2: memref<32x1xf32, #tpu.memory_space<vmem>>, %arg3: memref<32x4xf32, #tpu.memory_space<vmem>>, %arg4: memref<4x24xf32, #tpu.memory_space<vmem>>, %arg5: memref<1x8xf32, #tpu.memory_space<vmem>>, %arg6: memref<8x24xf32, #tpu.memory_space<vmem>>, %arg7: memref<1x8xf32, #tpu.memory_space<vmem>>, %arg8: memref<16x8xf32, #tpu.memory_space<vmem>>, %arg9: memref<32x8xf32, #tpu.memory_space<vmem>>) attributes {dimension_semantics = [#tpu.dimension_semantics<parallel>], iteration_bounds = array<i64: 1>, scalar_prefetch = 0 : i64, scratch_operands = 1 : i64, tpu.core_type = #tpu.core_type<tc>, window_params = [{pipeline_mode = #tpu.pipeline_mode<synchronous>, transform_indices = @transform_0, window_bounds = array<i64: 32, 1>}, {pipeline_mode = #tpu.pipeline_mode<synchronous>, transform_indices = @transform_1, window_bounds = array<i64: 32, 1>}, {transform_indices = @transform_2, window_bounds = array<i64: 32, 4>}, {pipeline_mode = #tpu.pipeline_mode<synchronous>, transform_indices = @transform_3, window_bounds = array<i64: 4, 24>}, {pipeline_mode = #tpu.pipeline_mode<synchronous>, transform_indices = @transform_4, window_bounds = array<i64: 1, 8>}, {pipeline_mode = #tpu.pipeline_mode<synchronous>, transform_indices = @transform_5, window_bounds = array<i64: 8, 24>}, {pipeline_mode = #tpu.pipeline_mode<synchronous>, transform_indices = @transform_6, window_bounds = array<i64: 1, 8>}, {transform_indices = @transform_7, window_bounds = array<i64: 16, 8>}]} {
    %c0 = arith.constant 0 : index
    %c0_0 = arith.constant 0 : index
    %0 = vector.load %arg1[%c0, %c0_0] : memref<32x1xf32, #tpu.memory_space<vmem>>, vector<32x1xf32>
    %c0_1 = arith.constant 0 : index
    %c0_2 = arith.constant 0 : index
    %1 = vector.load %arg2[%c0_1, %c0_2] : memref<32x1xf32, #tpu.memory_space<vmem>>, vector<32x1xf32>
    %c0_3 = arith.constant 0 : index
    %c0_4 = arith.constant 0 : index
    %2 = vector.load %arg3[%c0_3, %c0_4] : memref<32x4xf32, #tpu.memory_space<vmem>>, vector<32x4xf32>
    %c0_5 = arith.constant 0 : index
    %c0_6 = arith.constant 0 : index
    %3 = vector.load %arg4[%c0_5, %c0_6] : memref<4x24xf32, #tpu.memory_space<vmem>>, vector<4x24xf32>
    %cst = arith.constant dense<0.000000e+00> : vector<32x24xf32>
    %4 = tpu.matmul %2, %3, %cst {dimension_numbers = #tpu.dot_dimension_numbers<[1], [0], [0], [1], [0, 0, 1, 1], [], []>} : vector<32x4xf32>, vector<4x24xf32>, vector<32x24xf32> -> vector<32x24xf32>
    %5 = vector.extract_strided_slice %4 {offsets = [0, 0], sizes = [32, 8], strides = [1, 1]} : vector<32x24xf32> to vector<32x8xf32>
    %6 = vector.extract_strided_slice %4 {offsets = [0, 8], sizes = [32, 8], strides = [1, 1]} : vector<32x24xf32> to vector<32x8xf32>
    %7 = vector.extract_strided_slice %4 {offsets = [0, 16], sizes = [32, 8], strides = [1, 1]} : vector<32x24xf32> to vector<32x8xf32>
    %c1_i32 = arith.constant 1 : i32
    %8 = tpu.dynamic_rotate %5 by %c1_i32 dim 0 : vector<32x8xf32>, i32 -> vector<32x8xf32>
    %9 = vector.broadcast %0 : vector<32x1xf32> to vector<32x8xf32>
    %10 = arith.mulf %9, %8 : vector<32x8xf32>
    %11 = arith.addf %6, %10 : vector<32x8xf32>
    %c31_i32 = arith.constant 31 : i32
    %12 = tpu.dynamic_rotate %7 by %c31_i32 dim 0 : vector<32x8xf32>, i32 -> vector<32x8xf32>
    %13 = vector.broadcast %1 : vector<32x1xf32> to vector<32x8xf32>
    %14 = arith.mulf %13, %12 : vector<32x8xf32>
    %15 = arith.addf %11, %14 : vector<32x8xf32>
    %c0_7 = arith.constant 0 : index
    %c0_8 = arith.constant 0 : index
    %16 = vector.load %arg5[%c0_7, %c0_8] : memref<1x8xf32, #tpu.memory_space<vmem>>, vector<1x8xf32>
    %17 = vector.broadcast %16 : vector<1x8xf32> to vector<32x8xf32>
    %18 = arith.addf %15, %17 : vector<32x8xf32>
    %cst_9 = arith.constant 0.000000e+00 : f32
    %19 = vector.broadcast %cst_9 : f32 to vector<32x8xf32>
    %20 = arith.maximumf %18, %19 : vector<32x8xf32>
    %c0_10 = arith.constant 0 : index
    %c0_11 = arith.constant 0 : index
    %21 = vector.load %arg6[%c0_10, %c0_11] : memref<8x24xf32, #tpu.memory_space<vmem>>, vector<8x24xf32>
    %cst_12 = arith.constant dense<0.000000e+00> : vector<32x24xf32>
    %22 = tpu.matmul %20, %21, %cst_12 {dimension_numbers = #tpu.dot_dimension_numbers<[1], [0], [0], [1], [0, 0, 1, 1], [], []>} : vector<32x8xf32>, vector<8x24xf32>, vector<32x24xf32> -> vector<32x24xf32>
    %23 = vector.extract_strided_slice %22 {offsets = [0, 0], sizes = [32, 8], strides = [1, 1]} : vector<32x24xf32> to vector<32x8xf32>
    %24 = vector.extract_strided_slice %22 {offsets = [0, 8], sizes = [32, 8], strides = [1, 1]} : vector<32x24xf32> to vector<32x8xf32>
    %25 = vector.extract_strided_slice %22 {offsets = [0, 16], sizes = [32, 8], strides = [1, 1]} : vector<32x24xf32> to vector<32x8xf32>
    %c1_i32_13 = arith.constant 1 : i32
    %26 = tpu.dynamic_rotate %23 by %c1_i32_13 dim 0 : vector<32x8xf32>, i32 -> vector<32x8xf32>
    %27 = vector.broadcast %0 : vector<32x1xf32> to vector<32x8xf32>
    %28 = arith.mulf %27, %26 : vector<32x8xf32>
    %29 = arith.addf %24, %28 : vector<32x8xf32>
    %c31_i32_14 = arith.constant 31 : i32
    %30 = tpu.dynamic_rotate %25 by %c31_i32_14 dim 0 : vector<32x8xf32>, i32 -> vector<32x8xf32>
    %31 = vector.broadcast %1 : vector<32x1xf32> to vector<32x8xf32>
    %32 = arith.mulf %31, %30 : vector<32x8xf32>
    %33 = arith.addf %29, %32 : vector<32x8xf32>
    %c0_15 = arith.constant 0 : index
    %c0_16 = arith.constant 0 : index
    %34 = vector.load %arg7[%c0_15, %c0_16] : memref<1x8xf32, #tpu.memory_space<vmem>>, vector<1x8xf32>
    %35 = vector.broadcast %34 : vector<1x8xf32> to vector<32x8xf32>
    %36 = arith.addf %33, %35 : vector<32x8xf32>
    %cst_17 = arith.constant 0.000000e+00 : f32
    %37 = vector.broadcast %cst_17 : f32 to vector<32x8xf32>
    %38 = arith.maximumf %36, %37 : vector<32x8xf32>
    %c0_18 = arith.constant 0 : index
    %c0_19 = arith.constant 0 : index
    %39 = vector.load %arg9[%c0_18, %c0_19] : memref<32x8xf32, #tpu.memory_space<vmem>>, vector<32x8xf32>
    tpu.vector_store %arg9[%c0_18, %c0_19], %38 {strides = array<i32>} : memref<32x8xf32, #tpu.memory_space<vmem>>, vector<32x8xf32>,
    %c0_20 = arith.constant 0 : index
    %c0_21 = arith.constant 0 : index
    %40 = tpu.strided_load %arg9[%c0_20, %c0_21] {strides = array<i32: 2, 1>} : memref<32x8xf32, #tpu.memory_space<vmem>>, vector<16x8xf32>
    %c1 = arith.constant 1 : index
    %c0_22 = arith.constant 0 : index
    %41 = tpu.strided_load %arg9[%c1, %c0_22] {strides = array<i32: 2, 1>} : memref<32x8xf32, #tpu.memory_space<vmem>>, vector<16x8xf32>
    %42 = arith.maximumf %40, %41 : vector<16x8xf32>
    %c0_23 = arith.constant 0 : index
    %c0_24 = arith.constant 0 : index
    %43 = vector.load %arg8[%c0_23, %c0_24] : memref<16x8xf32, #tpu.memory_space<vmem>>, vector<16x8xf32>
    tpu.vector_store %arg8[%c0_23, %c0_24], %42 {strides = array<i32>} : memref<16x8xf32, #tpu.memory_space<vmem>>, vector<16x8xf32>,
    return
  }
  func.func @transform_0(%arg0: i32) -> (i32, i32) {
    %c0_i32 = arith.constant 0 : i32
    %c0_i32_0 = arith.constant 0 : i32
    %c0_i32_1 = arith.constant 0 : i32
    return %c0_i32, %c0_i32_0 : i32, i32
  }
  func.func @transform_1(%arg0: i32) -> (i32, i32) {
    %c0_i32 = arith.constant 0 : i32
    %c0_i32_0 = arith.constant 0 : i32
    %c0_i32_1 = arith.constant 0 : i32
    return %c0_i32, %c0_i32_0 : i32, i32
  }
  func.func @transform_2(%arg0: i32) -> (i32, i32) {
    %c0_i32 = arith.constant 0 : i32
    %c0_i32_0 = arith.constant 0 : i32
    return %arg0, %c0_i32 : i32, i32
  }
  func.func @transform_3(%arg0: i32) -> (i32, i32) {
    %c0_i32 = arith.constant 0 : i32
    %c0_i32_0 = arith.constant 0 : i32
    %c0_i32_1 = arith.constant 0 : i32
    return %c0_i32, %c0_i32_0 : i32, i32
  }
  func.func @transform_4(%arg0: i32) -> (i32, i32) {
    %c0_i32 = arith.constant 0 : i32
    %c0_i32_0 = arith.constant 0 : i32
    %c0_i32_1 = arith.constant 0 : i32
    return %c0_i32, %c0_i32_0 : i32, i32
  }
  func.func @transform_5(%arg0: i32) -> (i32, i32) {
    %c0_i32 = arith.constant 0 : i32
    %c0_i32_0 = arith.constant 0 : i32
    %c0_i32_1 = arith.constant 0 : i32
    return %c0_i32, %c0_i32_0 : i32, i32
  }
  func.func @transform_6(%arg0: i32) -> (i32, i32) {
    %c0_i32 = arith.constant 0 : i32
    %c0_i32_0 = arith.constant 0 : i32
    %c0_i32_1 = arith.constant 0 : i32
    return %c0_i32, %c0_i32_0 : i32, i32
  }
  func.func @transform_7(%arg0: i32) -> (i32, i32) {
    %c0_i32 = arith.constant 0 : i32
    %c0_i32_0 = arith.constant 0 : i32
    return %arg0, %c0_i32 : i32, i32
  }
}

</mosaic_0001>

<bundles_post_ra>
// kernel: tpu_custom_call.1
= control target key start
LH: loop header
LB: loop body
LE: loop exit
PB: predicated region body
PF: predicated region fallthrough
CT: control target
= control target key end

     0   :  { %vm52_vm0 = vcmask 1043456   ;;  %vm39_vm1 = vcmask 31744   ;;  %v564_v3 = vmov 0   ;;  %v145_v13 = vlaneseq  ;;  %s565_s23 = smov 112   ;;  %s567_s28 = smov 120   ;;  %s798_s3 = inlined_call_operand.vmem [shape: f32[4,24], index: 3, kind: input, shape index: {}]   ;;  %s799_s2 = inlined_call_operand.vmem [shape: f32[32,4], index: 2, kind: input, shape index: {}]   ;;  %s800_s0 = inlined_call_operand.vmem [shape: f32[32,1], index: 0, kind: input, shape index: {}]   ;;  %s801_s1 = inlined_call_operand.vmem [shape: f32[32,1], index: 1, kind: input, shape index: {}]   ;;  %s802_s4 = inlined_call_operand.vmem [shape: f32[1,8], index: 4, kind: input, shape index: {}]   ;;  %s803_s5 = inlined_call_operand.vmem [shape: f32[8,24], index: 5, kind: input, shape index: {}]   ;;  %s804_s6 = inlined_call_operand.vmem [shape: f32[1,8], index: 6, kind: input, shape index: {}]   ;;  %s805_s7 = inlined_call_operand.vmem [shape: f32[16,8], index: 7, kind: output, shape index: {}]  }
   0x1   :  { %v38_v0 = vld [vmem:[%s798_s3] sm:$0xf]  ;;  %v35_v2 = vld [vmem:[%s799_s2 + $0x8] sm:$0xff]  ;;  %562 = vset.pattern.permute.xlu0 %v564_v3  ;;  %563 = vset.pattern.permute.xlu1 %v564_v3  ;;  %v36_v4 = vld [vmem:[%s799_s2 + $0x10] sm:$0xff]  ;;  %vm295_vm4 = vcmask 64512  }
   0x2   :  { %v34_v1 = vld [vmem:[%s799_s2] sm:$0xff]  ;;  %542 = vmatprep.subr.msk.mxu0 %vm52_vm0, %v38_v0  ;;  %v27_v7 = vld [vmem:[%s800_s0 + $0x8] sm:$0xff]  ;;  %v37_v8 = vld [vmem:[%s799_s2 + $0x18] sm:$0xff]  ;;  %v650_v15 = vshrl.u32 %v145_v13, 7 }
   0x3   :  { %544 = vmatprep.mubr.msk.f32.mxu0 %vm39_vm1, %v34_v1  ;;  %v26_v5 = vld [vmem:[%s800_s0] sm:$0xff]  ;;  %543 = vmatpush3.msk.msra.mxu0 %vm52_vm0, %v38_v0  ;;  %v31_v9 = vld [vmem:[%s801_s1 + $0x8] sm:$0xff]  ;;  %v28_v10 = vld [vmem:[%s800_s0 + $0x10] sm:$0xff] }
   0x4   :  { %154 = vperm.xlu0 %562, %v26_v5   ;;  %v30_v6 = vld [vmem:[%s801_s1] sm:$0xff]  ;;  %545 = vmatmul.mubr.msk.f32.vlgmr.msra.gmra.mrb[0].mxu0 %vm39_vm1, %v35_v2  ;;  %v29_v11 = vld [vmem:[%s800_s0 + $0x18] sm:$0xff]  ;;  %v32_v12 = vld [vmem:[%s801_s1 + $0x10] sm:$0xff]  ;;  %vm147_vm2 = vcmp.lt.s32.totalorder %v650_v15, 1  ;;  %vm216_vm3 = vcmp.lt.s32.totalorder %v650_v15, 7 }
   0x5   :  { %223 = vperm.xlu1 %563, %v30_v6   ;;  %547 = vmatprep.mubr.msk.f32.mxu0 %vm39_vm1, %v36_v4  ;;  %v33_v21 = vld [vmem:[%s801_s1 + $0x18] sm:$0xff]  ;;  %s566_s1 = smov 8   ;;  %v526_v32 = vld [vmem:[%s802_s4] ss:$0 sm:$0xff] }
   0x6   :  { %v282_v59 = vld [vmem:[%s803_s5] sm:$0xff] }
   0x7   :  { %550 = vmatprep.subr.mxu1 %v282_v59 }
   0x8   :  { %159 = vperm.xlu0 %562, %v27_v7   ;;  %548 = vmatmul.mubr.msk.f32.gmra.mrb[2].mxu0 %vm39_vm1, %v37_v8 }
   0x9   :  { %228 = vperm.xlu1 %563, %v31_v9   ;;  %551 = vmatpush3.msra.mxu1 %v282_v59 }
   0xc   :  { %164 = vperm.xlu0 %562, %v28_v10  }
   0xd   :  { %169 = vperm.xlu1 %563, %v29_v11  }
  0x10   :  { %233 = vperm.xlu0 %562, %v32_v12  }
  0x83   :  { %v648_v14 = vpop.permute.xlu0 %154 }
  0x84   :  { %v698_v35 = vpop.permute.xlu1 %223 }
  0x87   :  { %v663_v20 = vpop.permute.xlu0 %159 }
  0x88   :  { %v700_v36 = vpop.permute.xlu1 %228 }
  0x8b   :  { %v685_v31 = vpop.permute.xlu0 %164 }
  0x8c   :  { %v702_v37 = vpop.permute.xlu1 %169 }
  0x8f   :  { %v704_v38 = vpop.permute.xlu0 %233 }
  0xd7   :  { %v652_v16 = vpop.f32.mrb[0].mxu0 }
  0xd8   :  { %v142_v17 = vrot.slane %v652_v16, 7  ;;  %v655_v18 = vpop.f32.mrb[1].mxu0  ;;  %202 = vrot.lane.b32.xlu1 %v652_v16, %s565_s23 }
  0xd9   :  { %v141_v19 = vrot.slane %v655_v18, 7  ;;  %200 = vrot.lane.b32.xlu0 %v655_v18, %s565_s23 }
  0xdb   :  { %v668_v22 = vpop.f32.mrb[2].mxu0  ;;  %v150_v23 = vsel %vm147_vm2, %v141_v19, %v142_v17 }
  0xdc   :  { %v144_v24 = vrot.slane %v668_v22, 7  ;;  %v673_v25 = vpop.f32.mrb[3].mxu0  ;;  %v173_v34 = vmul.f32 %v663_v20, %v150_v23 }
  0xdd   :  { %v143_v26 = vrot.slane %v673_v25, 7  ;;  %204 = vrot.lane.b32.xlu1 %v673_v25, %s565_s23  ;;  %238 = vperm.xlu0 %562, %v33_v21  }
  0xde   :  { %v151_v27 = vsel %vm147_vm2, %v144_v24, %v141_v19 }
  0xdf   :  { %v149_v28 = vsel %vm147_vm2, %v142_v17, %v143_v26  ;;  %v172_v29 = vmul.f32 %v648_v14, %v151_v27  ;;  %v148_v30 = vsel %vm147_vm2, %v143_v26, %v144_v24 }
  0xe0   :  { %v174_v33 = vmul.f32 %v685_v31, %v149_v28  ;;  %v175_v48 = vmul.f32 %v702_v37, %v148_v30 }
  0xe1   :  { %206 = vrot.lane.b32.xlu1 %v668_v22, %s565_s23  ;;  %180 = vrot.lane.b32.xlu0 %v172_v29, %s566_s1 }
  0xe5   :  { %271 = vrot.lane.b32.xlu1 %v526_v32, %s566_s1  ;;  %184 = vrot.lane.b32.xlu0 %v174_v33, %s566_s1 }
  0xe9   :  { %182 = vrot.lane.b32.xlu1 %v173_v34, %s566_s1 }
 0x14a   :  { %v203_v39 = vpop.permute.xlu1 %202 }
 0x14b   :  { %v213_v40 = vrot.slane %v203_v39, 1  ;;  %v201_v41 = vpop.permute.xlu0 %200 }
 0x14c   :  { %v212_v42 = vrot.slane %v201_v41, 1 }
 0x14e   :  { %v219_v43 = vsel %vm216_vm3, %v212_v42, %v213_v40 }
 0x14f   :  { %v205_v44 = vpop.permute.xlu1 %204  ;;  %v241_v45 = vmul.f32 %v698_v35, %v219_v43 }
 0x150   :  { %v214_v46 = vrot.slane %v205_v44, 1 }
 0x151   :  { %249 = vrot.lane.b32.xlu0 %v241_v45, %s566_s1 }
 0x152   :  { %v218_v47 = vsel %vm216_vm3, %v213_v40, %v214_v46 }
 0x153   :  { %v207_v49 = vpop.permute.xlu1 %206  ;;  %v242_v50 = vmul.f32 %v700_v36, %v218_v47 }
 0x154   :  { %v215_v51 = vrot.slane %v207_v49, 1 }
 0x155   :  { %251 = vrot.lane.b32.xlu1 %v242_v50, %s566_s1  ;;  %186 = vrot.lane.b32.xlu0 %v175_v48, %s566_s1 }
 0x156   :  { %v217_v52 = vsel %vm216_vm3, %v214_v46, %v215_v51  ;;  %v220_v54 = vsel %vm216_vm3, %v215_v51, %v212_v42 }
 0x157   :  { %v243_v53 = vmul.f32 %v704_v38, %v217_v52  ;;  %v272_v58 = vpop.permute.xlu1 %271 }
 0x159   :  { %253 = vrot.lane.b32.xlu1 %v243_v53, %s566_s1 }
 0x15b   :  { %v183_v62 = vpop.permute.xlu1 %182 }
 0x15c   :  { %v723_v55 = vpop.permute.xlu0 %238  ;;  %v193_v1 = vadd.f32 %v652_v16, %v183_v62 }
 0x15d   :  { %v244_v56 = vmul.f32 %v723_v55, %v220_v54 }
 0x15f   :  { %255 = vrot.lane.b32.xlu0 %v244_v56, %s566_s1 }
 0x160   :  { %v181_v57 = vpop.permute.xlu0 %180 }
 0x161   :  { %v192_v61 = vadd.f32 %v181_v57, %v655_v18 }
 0x164   :  { %v185_v60 = vpop.permute.xlu0 %184 }
 0x165   :  { %v194_v6 = vadd.f32 %v185_v60, %v673_v25 }
 0x1c3   :  { %v250_v63 = vpop.permute.xlu0 %249 }
 0x1c4   :  { %v261_v0 = vadd.f32 %v250_v63, %v192_v61 }
 0x1c6   :  { %v274_v2 = vadd.f32 %v272_v58, %v261_v0 }
 0x1c7   :  { %v252_v3 = vpop.permute.xlu1 %251  ;;  %v187_v11 = vpop.permute.xlu0 %186 }
 0x1c8   :  { %v278_v4 = vmax.f32 %v274_v2, 0.0  ;;  %v262_v5 = vadd.f32 %v252_v3, %v193_v1  ;;  %v195_v13 = vadd.f32 %v668_v22, %v187_v11 }
 0x1ca   :  { %v275_v7 = vadd.f32 %v272_v58, %v262_v5  ;;  %287 = vrot.lane.b32.xlu1 %v278_v4, %s567_s28 }
 0x1cb   :  { %v254_v8 = vpop.permute.xlu1 %253 }
 0x1cc   :  { %v279_v9 = vmax.f32 %v275_v7, 0.0  ;;  %v263_v10 = vadd.f32 %v254_v8, %v194_v6 }
 0x1ce   :  { %v276_v12 = vadd.f32 %v272_v58, %v263_v10  ;;  %289 = vrot.lane.b32.xlu0 %v279_v9, %s567_s28 }
 0x1d0   :  { %v280_v16 = vmax.f32 %v276_v12, 0.0 }
 0x1d1   :  { %v256_v17 = vpop.permute.xlu0 %255 }
 0x1d2   :  { %v264_v18 = vadd.f32 %v256_v17, %v195_v13  ;;  %291 = vrot.lane.b32.xlu1 %v280_v16, %s567_s28 }
 0x1d4   :  { %v277_v19 = vadd.f32 %v272_v58, %v264_v18 }
 0x1d6   :  { %v281_v21 = vmax.f32 %v277_v19, 0.0 }
 0x1d8   :  { %293 = vrot.lane.b32.xlu0 %v281_v21, %s567_s28 }
 0x23c   :  { %v288_v23 = vpop.permute.xlu1 %287 }
 0x23d   :  { %552 = vmatprep.mubr.msk.f32.mxu1 %vm295_vm4, %v288_v23 }
 0x240   :  { %v290_v24 = vpop.permute.xlu0 %289 }
 0x241   :  { %553 = vmatmul.mubr.msk.f32.vlgmr.msra.gmra.mrb[0].mxu1 %vm295_vm4, %v290_v24 }
 0x244   :  { %v292_v25 = vpop.permute.xlu1 %291 }
 0x245   :  { %555 = vmatprep.mubr.msk.f32.mxu1 %vm295_vm4, %v292_v25 }
 0x24a   :  { %v294_v22 = vpop.permute.xlu0 %293 }
 0x24b   :  { %556 = vmatmul.mubr.msk.f32.gmra.mrb[2].mxu1 %vm295_vm4, %v294_v22 }
 0x314   :  { %v554_v26 = vpop.f32.mrb[0].mxu1 }
 0x315   :  { %v390_v27 = vrot.slane %v554_v26, 7  ;;  %427 = vrot.lane.b32.xlu0 %v554_v26, %s565_s23  ;;  %v370_v28 = vpop.f32.mrb[1].mxu1 }
 0x316   :  { %v389_v29 = vrot.slane %v370_v28, 7  ;;  %425 = vrot.lane.b32.xlu1 %v370_v28, %s565_s23 }
 0x318   :  { %v395_v30 = vsel %vm147_vm2, %v389_v29, %v390_v27 }
 0x319   :  { %v398_v40 = vmul.f32 %v395_v30, %v663_v20 }
 0x31e   :  { %v557_v32 = vpop.f32.mrb[2].mxu1 }
 0x31f   :  { %v392_v33 = vrot.slane %v557_v32, 7  ;;  %431 = vrot.lane.b32.xlu0 %v557_v32, %s565_s23  ;;  %v380_v34 = vpop.f32.mrb[3].mxu1 }
 0x320   :  { %v391_v39 = vrot.slane %v380_v34, 7  ;;  %429 = vrot.lane.b32.xlu1 %v380_v34, %s565_s23 }
 0x321   :  { %v396_v41 = vsel %vm147_vm2, %v392_v33, %v389_v29 }
 0x322   :  { %v397_v42 = vmul.f32 %v396_v41, %v648_v14  ;;  %v393_v43 = vsel %vm147_vm2, %v391_v39, %v392_v33  ;;  %v394_v44 = vsel %vm147_vm2, %v390_v27, %v391_v39 }
 0x323   :  { %407 = vrot.lane.b32.xlu0 %v398_v40, %s566_s1  ;;  %v400_v45 = vmul.f32 %v393_v43, %v702_v37  ;;  %v399_v46 = vmul.f32 %v394_v44, %v685_v31 }
 0x324   :  { %405 = vrot.lane.b32.xlu1 %v397_v42, %s566_s1 }
 0x327   :  { %411 = vrot.lane.b32.xlu0 %v400_v45, %s566_s1 }
 0x328   :  { %409 = vrot.lane.b32.xlu1 %v399_v46, %s566_s1 }
 0x387   :  { %v428_v20 = vpop.permute.xlu0 %427 }
 0x388   :  { %v438_v14 = vrot.slane %v428_v20, 1  ;;  %v426_v47 = vpop.permute.xlu1 %425 }
 0x389   :  { %v437_v48 = vrot.slane %v426_v47, 1 }
 0x38b   :  { %v443_v49 = vsel %vm216_vm3, %v437_v48, %v438_v14 }
 0x38c   :  { %v445_v50 = vmul.f32 %v443_v49, %v698_v35  ;;  %v531_v35 = vld [vmem:[%s804_s6] ss:$0 sm:$0xff] }
 0x38e   :  { %453 = vrot.lane.b32.xlu1 %v445_v50, %s566_s1 }
 0x391   :  { %v432_v51 = vpop.permute.xlu0 %431 }
 0x392   :  { %v440_v52 = vrot.slane %v432_v51, 1  ;;  %v430_v37 = vpop.permute.xlu1 %429 }
 0x393   :  { %v439_v53 = vrot.slane %v430_v37, 1 }
 0x394   :  { %v444_v58 = vsel %vm216_vm3, %v440_v52, %v437_v48 }
 0x395   :  { %v442_v31 = vsel %vm216_vm3, %v438_v14, %v439_v53  ;;  %v441_v54 = vsel %vm216_vm3, %v439_v53, %v440_v52  ;;  %v448_v59 = vmul.f32 %v444_v58, %v723_v55  ;;  %v408_v60 = vpop.permute.xlu0 %407 }
 0x396   :  { %v446_v56 = vmul.f32 %v442_v31, %v700_v36  ;;  %v447_v57 = vmul.f32 %v441_v54, %v704_v38  ;;  %v406_v36 = vpop.permute.xlu1 %405  ;;  %v418_v0 = vadd.f32 %v554_v26, %v408_v60 }
 0x397   :  { %v417_v1 = vadd.f32 %v406_v36, %v370_v28 }
 0x398   :  { %455 = vrot.lane.b32.xlu0 %v446_v56, %s566_s1  ;;  %457 = vrot.lane.b32.xlu1 %v447_v57, %s566_s1 }
 0x399   :  { %v412_v61 = vpop.permute.xlu0 %411 }
 0x39a   :  { %v410_v38 = vpop.permute.xlu1 %409  ;;  %v420_v2 = vadd.f32 %v557_v32, %v412_v61 }
 0x39b   :  { %v419_v3 = vadd.f32 %v410_v38, %v380_v34 }
 0x39c   :  { %459 = vrot.lane.b32.xlu0 %v448_v59, %s566_s1  ;;  %475 = vrot.lane.b32.xlu1 %v531_v35, %s566_s1 }
 0x400   :  { %v454_v15 = vpop.permute.xlu1 %453 }
 0x401   :  { %v465_v4 = vadd.f32 %v454_v15, %v417_v1 }
 0x40a   :  { %v458_v62 = vpop.permute.xlu1 %457  ;;  %v456_v63 = vpop.permute.xlu0 %455 }
 0x40b   :  { %v466_v5 = vadd.f32 %v456_v63, %v418_v0  ;;  %v467_v55 = vadd.f32 %v458_v62, %v419_v3 }
 0x40e   :  { %v476_v6 = vpop.permute.xlu1 %475  ;;  %v460_v7 = vpop.permute.xlu0 %459 }
 0x40f   :  { %v468_v8 = vadd.f32 %v460_v7, %v420_v2  ;;  %v478_v9 = vadd.f32 %v476_v6, %v465_v4  ;;  %v479_v10 = vadd.f32 %v476_v6, %v466_v5  ;;  %v480_v16 = vadd.f32 %v476_v6, %v467_v55 }
 0x411   :  { %v481_v11 = vadd.f32 %v476_v6, %v468_v8  ;;  %v482_v12 = vmax.f32 %v478_v9, 0.0  ;;  %v483_v13 = vmax.f32 %v479_v10, 0.0  ;;  %v484_v18 = vmax.f32 %v480_v16, 0.0 }
 0x413   :  { %490 = vrot.lane.b32.xlu0 %v482_v12, %s567_s28  ;;  %492 = vrot.lane.b32.xlu1 %v483_v13, %s567_s28  ;;  %v485_v17 = vmax.f32 %v481_v11, 0.0 }
 0x417   :  { %494 = vrot.lane.b32.xlu0 %v484_v18, %s567_s28  ;;  %496 = vrot.lane.b32.xlu1 %v485_v17, %s567_s28 }
 0x485   :  { %v493_v19 = vpop.permute.xlu1 %492  ;;  %v491_v21 = vpop.permute.xlu0 %490 }
 0x486   :  { %503 = vst.msk [vmem:[#allocation2 + $0x8] sm:$0xff] %vm295_vm4, %v493_v19  ;;  %502 = vst.msk [vmem:[#allocation2] sm:$0xff] %vm295_vm4, %v491_v21 }
 0x489   :  { %v497_v23 = vpop.permute.xlu1 %496  ;;  %v495_v24 = vpop.permute.xlu0 %494 }
 0x48a   :  { %505 = vst.msk [vmem:[#allocation2 + $0x18] sm:$0xff] %vm295_vm4, %v497_v23  ;;  %504 = vst.msk [vmem:[#allocation2 + $0x10] sm:$0xff] %vm295_vm4, %v495_v24 }
 0x48d   :  { %v506_v25 = vld [vmem:[#allocation2] ss:$2 sm:$0xff]  ;;  %v510_v22 = vld [vmem:[#allocation2 + $0x1] ss:$2 sm:$0xff] }
 0x48e   :  { %v513_v26 = vmax.f32 %v506_v25, %v510_v22 }
 0x490   :  { %515 = vst.msk [vmem:[%s805_s7] sm:$0xff] %vm295_vm4, %v513_v26 }
 0x491   :  { %v508_v27 = vld [vmem:[#allocation2 + $0x10] ss:$2 sm:$0xff]  ;;  %v512_v28 = vld [vmem:[#allocation2 + $0x11] ss:$2 sm:$0xff] }
 0x492   :  { %v514_v29 = vmax.f32 %v508_v27, %v512_v28 }
 0x494   :  { %516 = vst.msk [vmem:[%s805_s7 + $0x8] sm:$0xff] %vm295_vm4, %v514_v29 }

</bundles_post_ra>
